<compile_context>
chip_gen: v6e
topology: v6e:2x2x1
jax: 0.10.0
libtpu: 0.0.40
codegen_flags: <defaults>
</compile_context>

<pallas_src>
import jax
import jax.numpy as jnp
from jax.experimental import pallas as pl
from jax.experimental.pallas import tpu as pltpu

EMBEDDING_SIZE = 256
IN_FEATURES = 10 * 128  # 1280
NUM_CLASSES = 2
PADDED_OUT = 128        # lane-dense output width (>= NUM_CLASSES)
MAX_TB = 512            # batch tile (rows); 512*1280*4 = 2.5 MiB per buffer


def _embedding_net_kernel(x_ref, w1_ref, b1_ref, alpha_ref, w2_ref, b2_ref,
                          out_ref):
    # x_ref:     (TB, 1280)    VMEM  (batch tile of flattened input)
    # w1_ref:    (1280, 256)   VMEM  (pre-transposed Linear-1 weight, resident)
    # b1_ref:    (1, 256)      VMEM
    # alpha_ref: (1, 1)        SMEM  (single shared PReLU parameter)
    # w2_ref:    (256, 128)    VMEM  (pre-transposed Linear-2 weight, zero-padded)
    # b2_ref:    (1, 128)      VMEM  (zero-padded bias)
    # out_ref:   (TB, 128)     VMEM  (lane-dense; cols 2..127 are junk+0-bias)
    x = x_ref[...]

    # Linear 1 (MXU) + bias
    h = jnp.dot(x, w1_ref[...], preferred_element_type=jnp.float32)
    h = h + b1_ref[...]

    # PReLU with a single shared parameter (nn.PReLU() default)
    alpha = alpha_ref[0, 0]
    h = jnp.where(h > 0, h, alpha * h)

    # Linear 2 (MXU) + bias, padded to 128 lanes for unmasked stores
    out = jnp.dot(h, w2_ref[...], preferred_element_type=jnp.float32)
    out = out + b2_ref[...]

    out_ref[...] = out.astype(out_ref.dtype)


def _round_up(n, m):
    return ((n + m - 1) // m) * m


def prepare_params(params):
    """One-time layout prep: transpose W1/W2 and pad layer-2 to 128 lanes."""
    w2_t_pad = jnp.zeros((EMBEDDING_SIZE, PADDED_OUT), jnp.float32)
    w2_t_pad = w2_t_pad.at[:, :NUM_CLASSES].set(params["w2"].T)
    b2_pad = jnp.zeros((1, PADDED_OUT), jnp.float32)
    b2_pad = b2_pad.at[0, :NUM_CLASSES].set(params["b2"])
    return {
        "w1_t": jnp.asarray(params["w1"].T, jnp.float32),        # (1280, 256)
        "b1": params["b1"].reshape(1, EMBEDDING_SIZE),            # (1, 256)
        "alpha": params["alpha"].reshape(1, 1),                   # (1, 1)
        "w2_t_pad": w2_t_pad,                                     # (256, 128)
        "b2_pad": b2_pad,                                         # (1, 128)
    }


def embedding_net_forward(x, prepared):
    """x: (B, 10, 128) float32 -> (B, 2) float32."""
    b = x.shape[0]
    x_flat = x.reshape(b, -1).astype(jnp.float32)  # same as torch .view(B, -1)
    assert x_flat.shape[1] == IN_FEATURES

    # Batch tile: multiple of 8, at most MAX_TB; pad B so every tile is full
    # (Pallas does not bounds-check VMEM refs — padded rows are sliced off).
    tb = min(MAX_TB, _round_up(b, 8))
    b_pad = _round_up(b, tb)
    if b_pad != b:
        x_flat = jnp.pad(x_flat, ((0, b_pad - b), (0, 0)))

    grid = (b_pad // tb,)

    cost = pl.CostEstimate(
        flops=(2 * b_pad * IN_FEATURES * EMBEDDING_SIZE
               + 2 * b_pad * EMBEDDING_SIZE * PADDED_OUT),
        transcendentals=0,
        bytes_accessed=(b_pad * IN_FEATURES * 4
                        + IN_FEATURES * EMBEDDING_SIZE * 4
                        + EMBEDDING_SIZE * PADDED_OUT * 4
                        + b_pad * PADDED_OUT * 4),
    )

    out_pad = pl.pallas_call(
        _embedding_net_kernel,
        out_shape=jax.ShapeDtypeStruct((b_pad, PADDED_OUT), jnp.float32),
        grid=grid,
        in_specs=[
            # x: batch-tiled, double-buffered by the pipeline
            pl.BlockSpec((tb, IN_FEATURES), lambda i: (i, 0)),
            # weights/biases: constant index_map -> stay resident in VMEM
            pl.BlockSpec((IN_FEATURES, EMBEDDING_SIZE), lambda i: (0, 0)),
            pl.BlockSpec((1, EMBEDDING_SIZE), lambda i: (0, 0)),
            pl.BlockSpec((1, 1), lambda i: (0, 0), memory_space=pltpu.SMEM),
            pl.BlockSpec((EMBEDDING_SIZE, PADDED_OUT), lambda i: (0, 0)),
            pl.BlockSpec((1, PADDED_OUT), lambda i: (0, 0)),
        ],
        out_specs=pl.BlockSpec((tb, PADDED_OUT), lambda i: (i, 0)),
        compiler_params=pltpu.CompilerParams(
            dimension_semantics=("parallel",),   # 2-TC scaling on v7x
            vmem_limit_bytes=24 << 20,           # sized for v7x's 64 MiB VMEM
        ),
        cost_estimate=cost,
    )(x_flat, prepared["w1_t"], prepared["b1"], prepared["alpha"],
      prepared["w2_t_pad"], prepared["b2_pad"])

    return out_pad[:b, :NUM_CLASSES]


def init_params(key):
    """Deterministic synthetic parameters (same shapes as the PyTorch module)."""
    k1, k2, k3, k4 = jax.random.split(key, 4)
    bound1 = 1.0 / jnp.sqrt(jnp.float32(IN_FEATURES))
    bound2 = 1.0 / jnp.sqrt(jnp.float32(EMBEDDING_SIZE))
    return {
        "w1": jax.random.uniform(k1, (EMBEDDING_SIZE, IN_FEATURES),
                                 jnp.float32, -bound1, bound1),
        "b1": jax.random.uniform(k2, (EMBEDDING_SIZE,), jnp.float32,
                                 -bound1, bound1),
        "alpha": jnp.array(0.25, jnp.float32),  # nn.PReLU() default init
        "w2": jax.random.uniform(k3, (NUM_CLASSES, EMBEDDING_SIZE),
                                 jnp.float32, -bound2, bound2),
        "b2": jax.random.uniform(k4, (NUM_CLASSES,), jnp.float32,
                                 -bound2, bound2),
    }


def _reference_forward(x, params):
    """Pure-JAX reference for correctness checking (PyTorch-shaped params)."""
    xf = x.reshape(x.shape[0], -1)
    h = xf @ params["w1"].T + params["b1"]
    h = jnp.where(h > 0, h, params["alpha"] * h)
    return h @ params["w2"].T + params["b2"]


if __name__ == "__main__":
    key = jax.random.PRNGKey(0)
    pkey, xkey = jax.random.split(key)
    params = init_params(pkey)
    prepared = prepare_params(params)   # one-time transpose/pad (not per call)

    batch = 2
    x = jax.random.normal(xkey, (batch, 10, 128), jnp.float32)

    out = embedding_net_forward(x, prepared)
    out = jax.block_until_ready(out)

    ref = _reference_forward(x, params)
    assert out.shape == (batch, NUM_CLASSES), out.shape
    assert jnp.allclose(out, ref, atol=1e-4, rtol=1e-4), "mismatch vs reference"

    print("KERNEL_OK")
</pallas_src>

<mosaic_0001>
module attributes {stable_mosaic.version = 11 : i64} {
  func.func @_embedding_net_kernel(%arg0: i32, %arg1: memref<8x1280xf32, #tpu.memory_space<vmem>>, %arg2: memref<1280x256xf32, #tpu.memory_space<vmem>>, %arg3: memref<1x256xf32, #tpu.memory_space<vmem>>, %arg4: memref<1x1xf32, #tpu.memory_space<smem>>, %arg5: memref<256x128xf32, #tpu.memory_space<vmem>>, %arg6: memref<1x128xf32, #tpu.memory_space<vmem>>, %arg7: memref<8x128xf32, #tpu.memory_space<vmem>>) attributes {dimension_semantics = [#tpu.dimension_semantics<parallel>], iteration_bounds = array<i64: 1>, scalar_prefetch = 0 : i64, scratch_operands = 0 : i64, tpu.core_type = #tpu.core_type<tc>, window_params = [{transform_indices = @transform_0, window_bounds = array<i64: 8, 1280>}, {pipeline_mode = #tpu.pipeline_mode<synchronous>, transform_indices = @transform_1, window_bounds = array<i64: 1280, 256>}, {pipeline_mode = #tpu.pipeline_mode<synchronous>, transform_indices = @transform_2, window_bounds = array<i64: 1, 256>}, {transform_indices = @transform_3, window_bounds = array<i64: 1, 1>}, {pipeline_mode = #tpu.pipeline_mode<synchronous>, transform_indices = @transform_4, window_bounds = array<i64: 256, 128>}, {pipeline_mode = #tpu.pipeline_mode<synchronous>, transform_indices = @transform_5, window_bounds = array<i64: 1, 128>}, {transform_indices = @transform_6, window_bounds = array<i64: 8, 128>}]} {
    %c0 = arith.constant 0 : index
    %c0_0 = arith.constant 0 : index
    %0 = vector.load %arg1[%c0, %c0_0] : memref<8x1280xf32, #tpu.memory_space<vmem>>, vector<8x1280xf32>
    %c0_1 = arith.constant 0 : index
    %c0_2 = arith.constant 0 : index
    %1 = vector.load %arg2[%c0_1, %c0_2] : memref<1280x256xf32, #tpu.memory_space<vmem>>, vector<1280x256xf32>
    %cst = arith.constant dense<0.000000e+00> : vector<8x256xf32>
    %2 = tpu.matmul %0, %1, %cst {dimension_numbers = #tpu.dot_dimension_numbers<[1], [0], [0], [1], [0, 0, 1, 1], [], []>} : vector<8x1280xf32>, vector<1280x256xf32>, vector<8x256xf32> -> vector<8x256xf32>
    %c0_3 = arith.constant 0 : index
    %c0_4 = arith.constant 0 : index
    %3 = vector.load %arg3[%c0_3, %c0_4] : memref<1x256xf32, #tpu.memory_space<vmem>>, vector<1x256xf32>
    %4 = vector.broadcast %3 : vector<1x256xf32> to vector<8x256xf32>
    %5 = arith.addf %2, %4 : vector<8x256xf32>
    %c0_5 = arith.constant 0 : index
    %c0_6 = arith.constant 0 : index
    %6 = memref.load %arg4[%c0_5, %c0_6] : memref<1x1xf32, #tpu.memory_space<smem>>
    %cst_7 = arith.constant 0.000000e+00 : f32
    %7 = vector.broadcast %cst_7 : f32 to vector<8x256xf32>
    %8 = arith.cmpf ogt, %5, %7 : vector<8x256xf32>
    %9 = vector.broadcast %6 : f32 to vector<8x256xf32>
    %10 = arith.mulf %9, %5 : vector<8x256xf32>
    %11 = arith.select %8, %5, %10 : vector<8x256xi1>, vector<8x256xf32>
    %c0_8 = arith.constant 0 : index
    %c0_9 = arith.constant 0 : index
    %12 = vector.load %arg5[%c0_8, %c0_9] : memref<256x128xf32, #tpu.memory_space<vmem>>, vector<256x128xf32>
    %cst_10 = arith.constant dense<0.000000e+00> : vector<8x128xf32>
    %13 = tpu.matmul %11, %12, %cst_10 {dimension_numbers = #tpu.dot_dimension_numbers<[1], [0], [0], [1], [0, 0, 1, 1], [], []>} : vector<8x256xf32>, vector<256x128xf32>, vector<8x128xf32> -> vector<8x128xf32>
    %c0_11 = arith.constant 0 : index
    %c0_12 = arith.constant 0 : index
    %14 = vector.load %arg6[%c0_11, %c0_12] : memref<1x128xf32, #tpu.memory_space<vmem>>, vector<1x128xf32>
    %15 = vector.broadcast %14 : vector<1x128xf32> to vector<8x128xf32>
    %16 = arith.addf %13, %15 : vector<8x128xf32>
    %c0_13 = arith.constant 0 : index
    %c0_14 = arith.constant 0 : index
    %17 = vector.load %arg7[%c0_13, %c0_14] : memref<8x128xf32, #tpu.memory_space<vmem>>, vector<8x128xf32>
    tpu.vector_store %arg7[%c0_13, %c0_14], %16 {strides = array<i32>} : memref<8x128xf32, #tpu.memory_space<vmem>>, vector<8x128xf32>,
    return
  }
  func.func @transform_0(%arg0: i32) -> (i32, i32) {
    %c0_i32 = arith.constant 0 : i32
    %c0_i32_0 = arith.constant 0 : i32
    return %arg0, %c0_i32 : i32, i32
  }
  func.func @transform_1(%arg0: i32) -> (i32, i32) {
    %c0_i32 = arith.constant 0 : i32
    %c0_i32_0 = arith.constant 0 : i32
    %c0_i32_1 = arith.constant 0 : i32
    return %c0_i32, %c0_i32_0 : i32, i32
  }
  func.func @transform_2(%arg0: i32) -> (i32, i32) {
    %c0_i32 = arith.constant 0 : i32
    %c0_i32_0 = arith.constant 0 : i32
    %c0_i32_1 = arith.constant 0 : i32
    return %c0_i32, %c0_i32_0 : i32, i32
  }
  func.func @transform_3(%arg0: i32) -> (i32, i32) {
    %c0_i32 = arith.constant 0 : i32
    %c0_i32_0 = arith.constant 0 : i32
    %c0_i32_1 = arith.constant 0 : i32
    return %c0_i32, %c0_i32_0 : i32, i32
  }
  func.func @transform_4(%arg0: i32) -> (i32, i32) {
    %c0_i32 = arith.constant 0 : i32
    %c0_i32_0 = arith.constant 0 : i32
    %c0_i32_1 = arith.constant 0 : i32
    return %c0_i32, %c0_i32_0 : i32, i32
  }
  func.func @transform_5(%arg0: i32) -> (i32, i32) {
    %c0_i32 = arith.constant 0 : i32
    %c0_i32_0 = arith.constant 0 : i32
    %c0_i32_1 = arith.constant 0 : i32
    return %c0_i32, %c0_i32_0 : i32, i32
  }
  func.func @transform_6(%arg0: i32) -> (i32, i32) {
    %c0_i32 = arith.constant 0 : i32
    %c0_i32_0 = arith.constant 0 : i32
    return %arg0, %c0_i32 : i32, i32
  }
}

</mosaic_0001>

<bundles_post_ra>
// kernel: tpu_custom_call.1
= control target key start
LH: loop header
LB: loop body
LE: loop exit
PB: predicated region body
PF: predicated region fallthrough
CT: control target
= control target key end

     0   :  { %12 = vsyncpa [#allocation4], 0  ;;  %s1159_s0 = inlined_call_operand.hbm [shape: f32[8,1280], index: 0, kind: input, shape index: {}]   ;;  %s1160_s1 = inlined_call_operand.hbm [shape: f32[1280,256], index: 1, kind: input, shape index: {}]   ;;  %s1161_s2 = inlined_call_operand.hbm [shape: f32[1,256], index: 2, kind: input, shape index: {}]   ;;  %s1162_s3 = inlined_call_operand.<no memory space> [shape: f32[1,1], index: 3, kind: input, shape index: {}]   ;;  %s1163_s4 = inlined_call_operand.hbm [shape: f32[256,128], index: 4, kind: input, shape index: {}]   ;;  %s1164_s5 = inlined_call_operand.hbm [shape: f32[1,128], index: 5, kind: input, shape index: {}]   ;;  %s1165_s6 = inlined_call_operand.hbm [shape: f32[8,128], index: 6, kind: output, shape index: {}]  }
   0x1   :  { %13 = vsyncpa [#allocation7], 0 }
   0x2   :  { %14 = vsyncpa [#allocation10], 0 }
   0x3   :  { %15 = vsyncpa [#allocation5], 0  ;;  %s1093_s21 = smov [#allocation6]  }
   0x4   :  { %s31_s22 = sshll.u32 %s1093_s21, 4  ;;  %s32_s22 = int_to_ptr.vmem [resolvable:$true] %s31_s22 }
   0x5   :  { %s973_s23 = scalar_lea.vmem %s32_s22, 40960  ;;  %p978_p1 = scmp.lt.s32.totalorder %s32_s22, %s32_s22 }
   0x6   :  { %p974_p0 = scmp.ne.s32.totalorder %s32_s22, %s973_s23  ;;  %p979_p2 = scmp.lt.s32.totalorder %s973_s23, %s973_s23 }
   0x8   :  { %p980_p3 = por %p979_p2, %p978_p1 }
   0xa   :  { %p981_p4 = pnand %p980_p3, %p974_p0 }
   0xc   :  { %984 = shalt.err (!%p981_p4)
}
   0xd   :  { %s1094_s24 = smov 256   ;;  %s1095_s25 = smov 16  }
   0xe   :  { %37 = dma.hbm_to_vmem [thread:$0]  %s1160_s1, 40960, %s32_s22, [#allocation7], %s1094_s24, %s1094_s24, %s1095_s25  }
   0xf   :  { %s1096_s28 = smov [#allocation9]  }
  0x10   :  { %s55_s29 = sshll.u32 %s1096_s28, 4  ;;  %s56_s29 = int_to_ptr.vmem [resolvable:$true] %s55_s29 }
  0x11   :  { %s993_s30 = scalar_lea.vmem %s56_s29, 4096  ;;  %p998_p6 = scmp.lt.s32.totalorder %s56_s29, %s56_s29 }
  0x12   :  { %p994_p5 = scmp.ne.s32.totalorder %s56_s29, %s993_s30  ;;  %p999_p7 = scmp.lt.s32.totalorder %s993_s30, %s993_s30 }
  0x14   :  { %p1000_p8 = por %p999_p7, %p998_p6 }
  0x16   :  { %p1001_p9 = pnand %p1000_p8, %p994_p5 }
  0x18   :  { %1004 = shalt.err (!%p1001_p9)
}
  0x19   :  { %s1097_s7 = smov 128   ;;  %s1098_s8 = smov 8  }
  0x1a   :  { %61 = dma.hbm_to_vmem [thread:$0]  %s1163_s4, 4096, %s56_s29, [#allocation10], %s1097_s7, %s1097_s7, %s1098_s8  }
  0x1b   :  { %s1099_s11 = smov [#allocation3]   ;;  %s1100_s13 = smov [#allocation8]  }
  0x1c   :  { %s22_s12 = sshll.u32 %s1099_s11, 4  ;;  %s44_s1 = sshll.u32 %s1100_s13, 4  ;;  %s23_s12 = int_to_ptr.vmem [resolvable:$true] %s22_s12  ;;  %s45_s1 = int_to_ptr.vmem [resolvable:$true] %s44_s1 }
  0x1d   :  { %s1013_s14 = scalar_lea.vmem %s23_s12, 1280  ;;  %p1018_p11 = scmp.lt.s32.totalorder %s23_s12, %s23_s12 }
  0x1e   :  { %p1014_p10 = scmp.ne.s32.totalorder %s23_s12, %s1013_s14  ;;  %p1019_p12 = scmp.lt.s32.totalorder %s1013_s14, %s1013_s14 }
  0x20   :  { %p1020_p13 = por %p1019_p12, %p1018_p11 }
  0x22   :  { %p1021_p0 = pnand %p1020_p13, %p1014_p10 }
  0x24   :  { %1024 = shalt.err (!%p1021_p0)
}
  0x25   :  { %25 = dma.hbm_to_vmem [thread:$0]  %s1159_s0, 1280, %s23_s12, [#allocation4]  }
  0x26   :  { %s1033_s17 = scalar_lea.vmem %s45_s1, 32  ;;  %p1038_p2 = scmp.lt.s32.totalorder %s45_s1, %s45_s1 }
  0x27   :  { %p1034_p1 = scmp.ne.s32.totalorder %s45_s1, %s1033_s17  ;;  %p1039_p3 = scmp.lt.s32.totalorder %s1033_s17, %s1033_s17 }
  0x29   :  { %p1040_p4 = por %p1039_p3, %p1038_p2 }
  0x2b   :  { %p1041_p5 = pnand %p1040_p4, %p1034_p1 }
  0x2d   :  { %1044 = shalt.err (!%p1041_p5)
}
  0x2e   :  { %47 = dma.hbm_to_vmem [thread:$0]  %s1161_s2, 32, %s45_s1, [#allocation7]  }
  0x2f   :  { %s1101_s19 = smov [#allocation11]  }
  0x30   :  { %s68_s20 = sshll.u32 %s1101_s19, 4  ;;  %s69_s20 = int_to_ptr.vmem [resolvable:$true] %s68_s20 }
  0x31   :  { %s1053_s21 = scalar_lea.vmem %s69_s20, 16  ;;  %s1057_s22 = scalar_lea.vmem %s69_s20, 32 }
  0x32   :  { %p1054_p6 = scmp.ne.s32.totalorder %s69_s20, %s1053_s21  ;;  %p1058_p7 = scmp.lt.s32.totalorder %s69_s20, %s69_s20 }
  0x33   :  { %p1059_p8 = scmp.lt.s32.totalorder %s1057_s22, %s1053_s21 }
  0x35   :  { %p1060_p9 = por %p1059_p8, %p1058_p7 }
  0x37   :  { %p1061_p10 = pnand %p1060_p9, %p1054_p6 }
  0x39   :  { %1064 = shalt.err (!%p1061_p10)
}
  0x3a   :  { %71 = dma.hbm_to_vmem [thread:$0]  %s1164_s5, 16, %s69_s20, [#allocation10]  }
  0x3b   :  { %1085 = dma.done.wait [#allocation4], 1280  }
  0x3c   :  { %1086 = vsyncadd [#allocation4], 4294966016 }
  0x3d   :  { %1087 = dma.done.wait [#allocation7], 40992  }
  0x3e   :  { %1088 = vsyncadd [#allocation7], 4294926304 }
  0x3f   :  { %1089 = dma.done.wait [#allocation10], 4112  }
  0x40   :  { %1090 = vsyncadd [#allocation10], 4294963184  ;;  %v128_v0 = vld [vmem:[#allocation6 + $0xf8] sm:$0xff]  ;;  %v127_v1 = vld [vmem:[#allocation6 + $0xf0] sm:$0xff]  ;;  %s1102_s24 = smov [#allocation12]  }
  0x41   :  { %v126_v2 = vld [vmem:[#allocation6 + $0xe8] sm:$0xff]  ;;  %429 = vmatprep.subr.mxu0 %v128_v0  ;;  %v192_v3 = vld [vmem:[#allocation6 + $0x2f8] sm:$0xff]  ;;  %v125_v4 = vld [vmem:[#allocation6 + $0xe0] sm:$0xff]  ;;  %s908_s25 = sshll.u32 %s1102_s24, 4  ;;  %s909_s25 = int_to_ptr.vmem [resolvable:$true] %s908_s25 }
  0x42   :  { %v191_v5 = vld [vmem:[#allocation6 + $0x2f0] sm:$0xff]  ;;  %430 = vmatpush1.msra.mxu0 %v127_v1  ;;  %500 = vmatprep.subr.mxu1 %v192_v3  ;;  %v124_v6 = vld [vmem:[#allocation6 + $0xd8] sm:$0xff]  ;;  %v190_v7 = vld [vmem:[#allocation6 + $0x2e8] sm:$0xff]  ;;  %p1070_p12 = scmp.lt.s32.totalorder %s909_s25, %s909_s25 }
  0x43   :  { %431 = vmatprep.subr.mxu0 %v126_v2  ;;  %501 = vmatpush1.msra.mxu1 %v191_v5  ;;  %v123_v8 = vld [vmem:[#allocation6 + $0xd0] sm:$0xff]  ;;  %v189_v9 = vld [vmem:[#allocation6 + $0x2e0] sm:$0xff]  ;;  %v188_v10 = vld [vmem:[#allocation6 + $0x2d8] sm:$0xff] }
  0x44   :  { %432 = vmatpush1.msra.mxu0 %v125_v4  ;;  %502 = vmatprep.subr.mxu1 %v190_v7  ;;  %v122_v11 = vld [vmem:[#allocation6 + $0xc8] sm:$0xff]  ;;  %v187_v12 = vld [vmem:[#allocation6 + $0x2d0] sm:$0xff]  ;;  %v121_v13 = vld [vmem:[#allocation6 + $0xc0] sm:$0xff] }
  0x45   :  { %433 = vmatprep.subr.mxu0 %v124_v6  ;;  %503 = vmatpush1.msra.mxu1 %v189_v9  ;;  %v186_v14 = vld [vmem:[#allocation6 + $0x2c8] sm:$0xff]  ;;  %v120_v15 = vld [vmem:[#allocation6 + $0xb8] sm:$0xff]  ;;  %v185_v16 = vld [vmem:[#allocation6 + $0x2c0] sm:$0xff] }
  0x46   :  { %434 = vmatpush1.msra.mxu0 %v123_v8  ;;  %504 = vmatprep.subr.mxu1 %v188_v10  ;;  %v119_v17 = vld [vmem:[#allocation6 + $0xb0] sm:$0xff]  ;;  %v184_v18 = vld [vmem:[#allocation6 + $0x2b8] sm:$0xff]  ;;  %v118_v19 = vld [vmem:[#allocation6 + $0xa8] sm:$0xff] }
  0x47   :  { %435 = vmatprep.subr.mxu0 %v122_v11  ;;  %505 = vmatpush1.msra.mxu1 %v187_v12  ;;  %v183_v20 = vld [vmem:[#allocation6 + $0x2b0] sm:$0xff]  ;;  %v117_v21 = vld [vmem:[#allocation6 + $0xa0] sm:$0xff]  ;;  %v182_v22 = vld [vmem:[#allocation6 + $0x2a8] sm:$0xff] }
  0x48   :  { %436 = vmatpush1.msra.mxu0 %v121_v13  ;;  %506 = vmatprep.subr.mxu1 %v186_v14  ;;  %v116_v23 = vld [vmem:[#allocation6 + $0x98] sm:$0xff]  ;;  %v181_v24 = vld [vmem:[#allocation6 + $0x2a0] sm:$0xff]  ;;  %v115_v25 = vld [vmem:[#allocation6 + $0x90] sm:$0xff] }
  0x49   :  { %437 = vmatprep.subr.mxu0 %v120_v15  ;;  %507 = vmatpush1.msra.mxu1 %v185_v16  ;;  %v180_v26 = vld [vmem:[#allocation6 + $0x298] sm:$0xff]  ;;  %v114_v27 = vld [vmem:[#allocation6 + $0x88] sm:$0xff]  ;;  %v179_v28 = vld [vmem:[#allocation6 + $0x290] sm:$0xff] }
  0x4a   :  { %438 = vmatpush1.msra.mxu0 %v119_v17  ;;  %508 = vmatprep.subr.mxu1 %v184_v18  ;;  %v113_v29 = vld [vmem:[#allocation6 + $0x80] sm:$0xff]  ;;  %v178_v30 = vld [vmem:[#allocation6 + $0x288] sm:$0xff]  ;;  %v112_v31 = vld [vmem:[#allocation6 + $0x78] sm:$0xff] }
  0x4b   :  { %439 = vmatprep.subr.mxu0 %v118_v19  ;;  %509 = vmatpush1.msra.mxu1 %v183_v20  ;;  %v177_v32 = vld [vmem:[#allocation6 + $0x280] sm:$0xff]  ;;  %v111_v33 = vld [vmem:[#allocation6 + $0x70] sm:$0xff]  ;;  %v176_v34 = vld [vmem:[#allocation6 + $0x278] sm:$0xff] }
  0x4c   :  { %440 = vmatpush1.msra.mxu0 %v117_v21  ;;  %510 = vmatprep.subr.mxu1 %v182_v22  ;;  %v110_v35 = vld [vmem:[#allocation6 + $0x68] sm:$0xff]  ;;  %v175_v36 = vld [vmem:[#allocation6 + $0x270] sm:$0xff]  ;;  %v109_v37 = vld [vmem:[#allocation6 + $0x60] sm:$0xff] }
  0x4d   :  { %441 = vmatprep.subr.mxu0 %v116_v23  ;;  %511 = vmatpush1.msra.mxu1 %v181_v24  ;;  %v174_v38 = vld [vmem:[#allocation6 + $0x268] sm:$0xff]  ;;  %v108_v39 = vld [vmem:[#allocation6 + $0x58] sm:$0xff]  ;;  %v173_v40 = vld [vmem:[#allocation6 + $0x260] sm:$0xff] }
  0x4e   :  { %442 = vmatpush1.msra.mxu0 %v115_v25  ;;  %512 = vmatprep.subr.mxu1 %v180_v26  ;;  %v107_v41 = vld [vmem:[#allocation6 + $0x50] sm:$0xff]  ;;  %v172_v42 = vld [vmem:[#allocation6 + $0x258] sm:$0xff]  ;;  %v106_v43 = vld [vmem:[#allocation6 + $0x48] sm:$0xff] }
  0x4f   :  { %443 = vmatprep.subr.mxu0 %v114_v27  ;;  %513 = vmatpush1.msra.mxu1 %v179_v28  ;;  %v171_v44 = vld [vmem:[#allocation6 + $0x250] sm:$0xff]  ;;  %v105_v45 = vld [vmem:[#allocation6 + $0x40] sm:$0xff]  ;;  %v170_v46 = vld [vmem:[#allocation6 + $0x248] sm:$0xff] }
  0x50   :  { %444 = vmatpush1.msra.mxu0 %v113_v29  ;;  %514 = vmatprep.subr.mxu1 %v178_v30  ;;  %v104_v47 = vld [vmem:[#allocation6 + $0x38] sm:$0xff]  ;;  %v169_v48 = vld [vmem:[#allocation6 + $0x240] sm:$0xff]  ;;  %v103_v49 = vld [vmem:[#allocation6 + $0x30] sm:$0xff] }
  0x51   :  { %445 = vmatprep.subr.mxu0 %v112_v31  ;;  %515 = vmatpush1.msra.mxu1 %v177_v32  ;;  %v168_v50 = vld [vmem:[#allocation6 + $0x238] sm:$0xff]  ;;  %v102_v51 = vld [vmem:[#allocation6 + $0x28] sm:$0xff]  ;;  %v167_v52 = vld [vmem:[#allocation6 + $0x230] sm:$0xff] }
  0x52   :  { %446 = vmatpush1.msra.mxu0 %v111_v33  ;;  %516 = vmatprep.subr.mxu1 %v176_v34  ;;  %v101_v53 = vld [vmem:[#allocation6 + $0x20] sm:$0xff]  ;;  %v166_v54 = vld [vmem:[#allocation6 + $0x228] sm:$0xff]  ;;  %v100_v55 = vld [vmem:[#allocation6 + $0x18] sm:$0xff] }
  0x53   :  { %447 = vmatprep.subr.mxu0 %v110_v35  ;;  %517 = vmatpush1.msra.mxu1 %v175_v36  ;;  %v165_v56 = vld [vmem:[#allocation6 + $0x220] sm:$0xff]  ;;  %v99_v57 = vld [vmem:[#allocation6 + $0x10] sm:$0xff]  ;;  %v164_v58 = vld [vmem:[#allocation6 + $0x218] sm:$0xff] }
  0x54   :  { %448 = vmatpush1.msra.mxu0 %v109_v37  ;;  %518 = vmatprep.subr.mxu1 %v174_v38  ;;  %v98_v59 = vld [vmem:[#allocation6 + $0x8] sm:$0xff]  ;;  %v163_v60 = vld [vmem:[#allocation6 + $0x210] sm:$0xff]  ;;  %v97_v61 = vld [vmem:[#allocation6] sm:$0xff] }
  0x55   :  { %449 = vmatprep.subr.mxu0 %v108_v39  ;;  %519 = vmatpush1.msra.mxu1 %v173_v40  ;;  %v162_v62 = vld [vmem:[#allocation6 + $0x208] sm:$0xff]  ;;  %v160_v63 = vld [vmem:[#allocation6 + $0x1f8] sm:$0xff]  ;;  %v161_v0 = vld [vmem:[#allocation6 + $0x200] sm:$0xff] }
  0x56   :  { %450 = vmatpush1.msra.mxu0 %v107_v41  ;;  %520 = vmatprep.subr.mxu1 %v172_v42  ;;  %v159_v1 = vld [vmem:[#allocation6 + $0x1f0] sm:$0xff]  ;;  %v224_v2 = vld [vmem:[#allocation6 + $0x3f8] sm:$0xff]  ;;  %v158_v3 = vld [vmem:[#allocation6 + $0x1e8] sm:$0xff] }
  0x57   :  { %451 = vmatprep.subr.mxu0 %v106_v43  ;;  %521 = vmatpush1.msra.mxu1 %v171_v44  ;;  %v223_v4 = vld [vmem:[#allocation6 + $0x3f0] sm:$0xff]  ;;  %v157_v5 = vld [vmem:[#allocation6 + $0x1e0] sm:$0xff]  ;;  %v222_v6 = vld [vmem:[#allocation6 + $0x3e8] sm:$0xff] }
  0x58   :  { %452 = vmatpush1.msra.mxu0 %v105_v45  ;;  %522 = vmatprep.subr.mxu1 %v170_v46  ;;  %v156_v7 = vld [vmem:[#allocation6 + $0x1d8] sm:$0xff]  ;;  %v221_v8 = vld [vmem:[#allocation6 + $0x3e0] sm:$0xff]  ;;  %v155_v9 = vld [vmem:[#allocation6 + $0x1d0] sm:$0xff] }
  0x59   :  { %453 = vmatprep.subr.mxu0 %v104_v47  ;;  %523 = vmatpush1.msra.mxu1 %v169_v48  ;;  %v220_v10 = vld [vmem:[#allocation6 + $0x3d8] sm:$0xff]  ;;  %v154_v11 = vld [vmem:[#allocation6 + $0x1c8] sm:$0xff]  ;;  %v219_v12 = vld [vmem:[#allocation6 + $0x3d0] sm:$0xff] }
  0x5a   :  { %454 = vmatpush1.msra.mxu0 %v103_v49  ;;  %524 = vmatprep.subr.mxu1 %v168_v50  ;;  %v153_v13 = vld [vmem:[#allocation6 + $0x1c0] sm:$0xff]  ;;  %v218_v14 = vld [vmem:[#allocation6 + $0x3c8] sm:$0xff]  ;;  %v152_v15 = vld [vmem:[#allocation6 + $0x1b8] sm:$0xff] }
  0x5b   :  { %455 = vmatprep.subr.mxu0 %v102_v51  ;;  %525 = vmatpush1.msra.mxu1 %v167_v52  ;;  %v217_v16 = vld [vmem:[#allocation6 + $0x3c0] sm:$0xff]  ;;  %v151_v17 = vld [vmem:[#allocation6 + $0x1b0] sm:$0xff]  ;;  %v216_v18 = vld [vmem:[#allocation6 + $0x3b8] sm:$0xff] }
  0x5c   :  { %456 = vmatpush1.msra.mxu0 %v101_v53  ;;  %526 = vmatprep.subr.mxu1 %v166_v54  ;;  %v150_v19 = vld [vmem:[#allocation6 + $0x1a8] sm:$0xff]  ;;  %v215_v20 = vld [vmem:[#allocation6 + $0x3b0] sm:$0xff]  ;;  %v149_v21 = vld [vmem:[#allocation6 + $0x1a0] sm:$0xff] }
  0x5d   :  { %457 = vmatprep.subr.mxu0 %v100_v55  ;;  %527 = vmatpush1.msra.mxu1 %v165_v56  ;;  %v214_v22 = vld [vmem:[#allocation6 + $0x3a8] sm:$0xff]  ;;  %v148_v23 = vld [vmem:[#allocation6 + $0x198] sm:$0xff]  ;;  %v213_v24 = vld [vmem:[#allocation6 + $0x3a0] sm:$0xff] }
  0x5e   :  { %458 = vmatpush1.msra.mxu0 %v99_v57  ;;  %528 = vmatprep.subr.mxu1 %v164_v58  ;;  %v147_v25 = vld [vmem:[#allocation6 + $0x190] sm:$0xff]  ;;  %v212_v26 = vld [vmem:[#allocation6 + $0x398] sm:$0xff]  ;;  %v146_v27 = vld [vmem:[#allocation6 + $0x188] sm:$0xff] }
  0x5f   :  { %459 = vmatprep.subr.mxu0 %v98_v59  ;;  %529 = vmatpush1.msra.mxu1 %v163_v60  ;;  %v211_v28 = vld [vmem:[#allocation6 + $0x390] sm:$0xff]  ;;  %v145_v29 = vld [vmem:[#allocation6 + $0x180] sm:$0xff]  ;;  %v210_v30 = vld [vmem:[#allocation6 + $0x388] sm:$0xff] }
  0x60   :  { %460 = vmatpush1.msra.mxu0 %v97_v61  ;;  %530 = vmatprep.subr.mxu1 %v162_v62  ;;  %v144_v31 = vld [vmem:[#allocation6 + $0x178] sm:$0xff]  ;;  %v209_v32 = vld [vmem:[#allocation6 + $0x380] sm:$0xff]  ;;  %v143_v33 = vld [vmem:[#allocation6 + $0x170] sm:$0xff] }
  0x61   :  { %461 = vmatprep.subr.mxu0 %v160_v63  ;;  %531 = vmatpush1.msra.mxu1 %v161_v0  ;;  %v208_v34 = vld [vmem:[#allocation6 + $0x378] sm:$0xff]  ;;  %v142_v35 = vld [vmem:[#allocation6 + $0x168] sm:$0xff]  ;;  %v207_v36 = vld [vmem:[#allocation6 + $0x370] sm:$0xff] }
  0x62   :  { %462 = vmatpush2.msra.mxu0 %v159_v1  ;;  %532 = vmatprep.subr.mxu1 %v224_v2  ;;  %v141_v37 = vld [vmem:[#allocation6 + $0x160] sm:$0xff]  ;;  %v206_v38 = vld [vmem:[#allocation6 + $0x368] sm:$0xff]  ;;  %v140_v39 = vld [vmem:[#allocation6 + $0x158] sm:$0xff] }
  0x63   :  { %463 = vmatprep.subr.mxu0 %v158_v3  ;;  %533 = vmatpush2.msra.mxu1 %v223_v4  ;;  %v205_v40 = vld [vmem:[#allocation6 + $0x360] sm:$0xff]  ;;  %v139_v41 = vld [vmem:[#allocation6 + $0x150] sm:$0xff]  ;;  %v204_v42 = vld [vmem:[#allocation6 + $0x358] sm:$0xff] }
  0x64   :  { %464 = vmatpush2.msra.mxu0 %v157_v5  ;;  %534 = vmatprep.subr.mxu1 %v222_v6  ;;  %v138_v43 = vld [vmem:[#allocation6 + $0x148] sm:$0xff]  ;;  %v203_v44 = vld [vmem:[#allocation6 + $0x350] sm:$0xff]  ;;  %v137_v45 = vld [vmem:[#allocation6 + $0x140] sm:$0xff] }
  0x65   :  { %465 = vmatprep.subr.mxu0 %v156_v7  ;;  %535 = vmatpush2.msra.mxu1 %v221_v8  ;;  %v202_v46 = vld [vmem:[#allocation6 + $0x348] sm:$0xff]  ;;  %v136_v47 = vld [vmem:[#allocation6 + $0x138] sm:$0xff]  ;;  %v201_v48 = vld [vmem:[#allocation6 + $0x340] sm:$0xff] }
  0x66   :  { %466 = vmatpush2.msra.mxu0 %v155_v9  ;;  %536 = vmatprep.subr.mxu1 %v220_v10  ;;  %v135_v49 = vld [vmem:[#allocation6 + $0x130] sm:$0xff]  ;;  %v200_v50 = vld [vmem:[#allocation6 + $0x338] sm:$0xff]  ;;  %v134_v51 = vld [vmem:[#allocation6 + $0x128] sm:$0xff] }
  0x67   :  { %467 = vmatprep.subr.mxu0 %v154_v11  ;;  %537 = vmatpush2.msra.mxu1 %v219_v12  ;;  %v199_v52 = vld [vmem:[#allocation6 + $0x330] sm:$0xff]  ;;  %v133_v53 = vld [vmem:[#allocation6 + $0x120] sm:$0xff]  ;;  %v198_v54 = vld [vmem:[#allocation6 + $0x328] sm:$0xff] }
  0x68   :  { %468 = vmatpush2.msra.mxu0 %v153_v13  ;;  %538 = vmatprep.subr.mxu1 %v218_v14  ;;  %v132_v55 = vld [vmem:[#allocation6 + $0x118] sm:$0xff]  ;;  %v197_v56 = vld [vmem:[#allocation6 + $0x320] sm:$0xff]  ;;  %v131_v57 = vld [vmem:[#allocation6 + $0x110] sm:$0xff] }
  0x69   :  { %469 = vmatprep.subr.mxu0 %v152_v15  ;;  %539 = vmatpush2.msra.mxu1 %v217_v16  ;;  %v196_v58 = vld [vmem:[#allocation6 + $0x318] sm:$0xff]  ;;  %v130_v59 = vld [vmem:[#allocation6 + $0x108] sm:$0xff]  ;;  %v129_v61 = vld [vmem:[#allocation6 + $0x100] sm:$0xff] }
  0x6a   :  { %470 = vmatpush2.msra.mxu0 %v151_v17  ;;  %540 = vmatprep.subr.mxu1 %v216_v18  ;;  %v88_v60 = vld [vmem:[#allocation3 + $0x8] sm:$0xff]  ;;  %v195_v62 = vld [vmem:[#allocation6 + $0x310] sm:$0xff]  ;;  %v194_v0 = vld [vmem:[#allocation6 + $0x308] sm:$0xff] }
  0x6b   :  { %471 = vmatprep.subr.mxu0 %v150_v19  ;;  %541 = vmatpush2.msra.mxu1 %v215_v20  ;;  %v87_v63 = vld [vmem:[#allocation3] sm:$0xff]  ;;  %v256_v1 = vld [vmem:[#allocation6 + $0x4f8] sm:$0xff]  ;;  %v193_v2 = vld [vmem:[#allocation6 + $0x300] sm:$0xff] }
  0x6c   :  { %472 = vmatpush2.msra.mxu0 %v149_v21  ;;  %542 = vmatprep.subr.mxu1 %v214_v22  ;;  %v90_v3 = vld [vmem:[#allocation3 + $0x18] sm:$0xff]  ;;  %v255_v4 = vld [vmem:[#allocation6 + $0x4f0] sm:$0xff]  ;;  %v89_v5 = vld [vmem:[#allocation3 + $0x10] sm:$0xff] }
  0x6d   :  { %473 = vmatprep.subr.mxu0 %v148_v23  ;;  %543 = vmatpush2.msra.mxu1 %v213_v24  ;;  %v254_v6 = vld [vmem:[#allocation6 + $0x4e8] sm:$0xff]  ;;  %v320_v7 = vld [vmem:[#allocation6 + $0x6f8] sm:$0xff]  ;;  %v253_v8 = vld [vmem:[#allocation6 + $0x4e0] sm:$0xff] }
  0x6e   :  { %474 = vmatpush2.msra.mxu0 %v147_v25  ;;  %544 = vmatprep.subr.mxu1 %v212_v26  ;;  %v319_v9 = vld [vmem:[#allocation6 + $0x6f0] sm:$0xff]  ;;  %v252_v10 = vld [vmem:[#allocation6 + $0x4d8] sm:$0xff]  ;;  %v318_v11 = vld [vmem:[#allocation6 + $0x6e8] sm:$0xff] }
  0x6f   :  { %475 = vmatprep.subr.mxu0 %v146_v27  ;;  %545 = vmatpush2.msra.mxu1 %v211_v28  ;;  %v251_v12 = vld [vmem:[#allocation6 + $0x4d0] sm:$0xff]  ;;  %v317_v13 = vld [vmem:[#allocation6 + $0x6e0] sm:$0xff]  ;;  %v250_v14 = vld [vmem:[#allocation6 + $0x4c8] sm:$0xff] }
  0x70   :  { %476 = vmatpush2.msra.mxu0 %v145_v29  ;;  %546 = vmatprep.subr.mxu1 %v210_v30  ;;  %v316_v15 = vld [vmem:[#allocation6 + $0x6d8] sm:$0xff]  ;;  %v249_v16 = vld [vmem:[#allocation6 + $0x4c0] sm:$0xff]  ;;  %v315_v17 = vld [vmem:[#allocation6 + $0x6d0] sm:$0xff] }
  0x71   :  { %477 = vmatprep.subr.mxu0 %v144_v31  ;;  %547 = vmatpush2.msra.mxu1 %v209_v32  ;;  %v248_v18 = vld [vmem:[#allocation6 + $0x4b8] sm:$0xff]  ;;  %v314_v19 = vld [vmem:[#allocation6 + $0x6c8] sm:$0xff]  ;;  %v247_v20 = vld [vmem:[#allocation6 + $0x4b0] sm:$0xff] }
  0x72   :  { %478 = vmatpush2.msra.mxu0 %v143_v33  ;;  %548 = vmatprep.subr.mxu1 %v208_v34  ;;  %v313_v21 = vld [vmem:[#allocation6 + $0x6c0] sm:$0xff]  ;;  %v246_v22 = vld [vmem:[#allocation6 + $0x4a8] sm:$0xff]  ;;  %v312_v23 = vld [vmem:[#allocation6 + $0x6b8] sm:$0xff] }
  0x73   :  { %479 = vmatprep.subr.mxu0 %v142_v35  ;;  %549 = vmatpush2.msra.mxu1 %v207_v36  ;;  %v245_v24 = vld [vmem:[#allocation6 + $0x4a0] sm:$0xff]  ;;  %v311_v25 = vld [vmem:[#allocation6 + $0x6b0] sm:$0xff]  ;;  %v244_v26 = vld [vmem:[#allocation6 + $0x498] sm:$0xff] }
  0x74   :  { %480 = vmatpush2.msra.mxu0 %v141_v37  ;;  %550 = vmatprep.subr.mxu1 %v206_v38  ;;  %v310_v27 = vld [vmem:[#allocation6 + $0x6a8] sm:$0xff]  ;;  %v243_v28 = vld [vmem:[#allocation6 + $0x490] sm:$0xff]  ;;  %v309_v29 = vld [vmem:[#allocation6 + $0x6a0] sm:$0xff] }
  0x75   :  { %481 = vmatprep.subr.mxu0 %v140_v39  ;;  %551 = vmatpush2.msra.mxu1 %v205_v40  ;;  %v242_v30 = vld [vmem:[#allocation6 + $0x488] sm:$0xff]  ;;  %v308_v31 = vld [vmem:[#allocation6 + $0x698] sm:$0xff]  ;;  %v241_v32 = vld [vmem:[#allocation6 + $0x480] sm:$0xff] }
  0x76   :  { %482 = vmatpush2.msra.mxu0 %v139_v41  ;;  %552 = vmatprep.subr.mxu1 %v204_v42  ;;  %v307_v33 = vld [vmem:[#allocation6 + $0x690] sm:$0xff]  ;;  %v240_v34 = vld [vmem:[#allocation6 + $0x478] sm:$0xff]  ;;  %v306_v35 = vld [vmem:[#allocation6 + $0x688] sm:$0xff] }
  0x77   :  { %483 = vmatprep.subr.mxu0 %v138_v43  ;;  %553 = vmatpush2.msra.mxu1 %v203_v44  ;;  %v239_v36 = vld [vmem:[#allocation6 + $0x470] sm:$0xff]  ;;  %v305_v37 = vld [vmem:[#allocation6 + $0x680] sm:$0xff]  ;;  %v238_v38 = vld [vmem:[#allocation6 + $0x468] sm:$0xff] }
  0x78   :  { %484 = vmatpush2.msra.mxu0 %v137_v45  ;;  %554 = vmatprep.subr.mxu1 %v202_v46  ;;  %v304_v39 = vld [vmem:[#allocation6 + $0x678] sm:$0xff]  ;;  %v237_v40 = vld [vmem:[#allocation6 + $0x460] sm:$0xff]  ;;  %v303_v41 = vld [vmem:[#allocation6 + $0x670] sm:$0xff] }
  0x79   :  { %485 = vmatprep.subr.mxu0 %v136_v47  ;;  %555 = vmatpush2.msra.mxu1 %v201_v48  ;;  %v236_v42 = vld [vmem:[#allocation6 + $0x458] sm:$0xff]  ;;  %v302_v43 = vld [vmem:[#allocation6 + $0x668] sm:$0xff]  ;;  %v235_v44 = vld [vmem:[#allocation6 + $0x450] sm:$0xff] }
  0x7a   :  { %486 = vmatpush2.msra.mxu0 %v135_v49  ;;  %556 = vmatprep.subr.mxu1 %v200_v50  ;;  %v301_v45 = vld [vmem:[#allocation6 + $0x660] sm:$0xff]  ;;  %v234_v46 = vld [vmem:[#allocation6 + $0x448] sm:$0xff]  ;;  %v300_v47 = vld [vmem:[#allocation6 + $0x658] sm:$0xff] }
  0x7b   :  { %487 = vmatprep.subr.mxu0 %v134_v51  ;;  %557 = vmatpush2.msra.mxu1 %v199_v52  ;;  %v233_v48 = vld [vmem:[#allocation6 + $0x440] sm:$0xff]  ;;  %v299_v49 = vld [vmem:[#allocation6 + $0x650] sm:$0xff]  ;;  %v232_v50 = vld [vmem:[#allocation6 + $0x438] sm:$0xff] }
  0x7c   :  { %488 = vmatpush2.msra.mxu0 %v133_v53  ;;  %558 = vmatprep.subr.mxu1 %v198_v54  ;;  %v298_v51 = vld [vmem:[#allocation6 + $0x648] sm:$0xff]  ;;  %v231_v52 = vld [vmem:[#allocation6 + $0x430] sm:$0xff]  ;;  %v297_v53 = vld [vmem:[#allocation6 + $0x640] sm:$0xff] }
  0x7d   :  { %489 = vmatprep.subr.mxu0 %v132_v55  ;;  %559 = vmatpush2.msra.mxu1 %v197_v56  ;;  %v230_v54 = vld [vmem:[#allocation6 + $0x428] sm:$0xff]  ;;  %v296_v55 = vld [vmem:[#allocation6 + $0x638] sm:$0xff]  ;;  %v229_v56 = vld [vmem:[#allocation6 + $0x420] sm:$0xff] }
  0x7e   :  { %490 = vmatpush2.msra.mxu0 %v131_v57  ;;  %560 = vmatprep.subr.mxu1 %v196_v58  ;;  %v295_v57 = vld [vmem:[#allocation6 + $0x630] sm:$0xff]  ;;  %v228_v58 = vld [vmem:[#allocation6 + $0x418] sm:$0xff] }
  0x7f   :  { %491 = vmatprep.subr.mxu0 %v130_v59  ;;  %493 = vmatprep.mubr.f32.mxu0 %v88_v60  ;;  %v294_v59 = vld [vmem:[#allocation6 + $0x628] sm:$0xff]  ;;  %v227_v60 = vld [vmem:[#allocation6 + $0x410] sm:$0xff] }
  0x80   :  { %492 = vmatpush2.msra.mxu0 %v129_v61  ;;  %561 = vmatpush2.msra.mxu1 %v195_v62  ;;  %v293_v61 = vld [vmem:[#allocation6 + $0x620] sm:$0xff]  ;;  %v226_v62 = vld [vmem:[#allocation6 + $0x408] sm:$0xff] }
  0x81   :  { %494 = vmatmul.mubr.f32.vlgmr.msra.gmra.mxu0 %v87_v63  ;;  %562 = vmatprep.subr.mxu1 %v194_v0  ;;  %v292_v63 = vld [vmem:[#allocation6 + $0x618] sm:$0xff]  ;;  %v225_v0 = vld [vmem:[#allocation6 + $0x400] sm:$0xff] }
  0x82   :  { %571 = vmatprep.subr.mxu0 %v256_v1  ;;  %563 = vmatpush2.msra.mxu1 %v193_v2  ;;  %v291_v1 = vld [vmem:[#allocation6 + $0x610] sm:$0xff]  ;;  %v288_v2 = vld [vmem:[#allocation6 + $0x5f8] sm:$0xff] }
  0x83   :  { %564 = vmatprep.mubr.f32.mxu1 %v90_v3  ;;  %572 = vmatpush1.msra.mxu0 %v255_v4  ;;  %v290_v3 = vld [vmem:[#allocation6 + $0x608] sm:$0xff]  ;;  %v287_v4 = vld [vmem:[#allocation6 + $0x5f0] sm:$0xff] }
  0x84   :  { %565 = vmatmul.mubr.f32.vlgmr.msra.gmra.mxu1 %v89_v5  ;;  %573 = vmatprep.subr.mxu0 %v254_v6  ;;  %v289_v5 = vld [vmem:[#allocation6 + $0x600] sm:$0xff]  ;;  %v286_v6 = vld [vmem:[#allocation6 + $0x5e8] sm:$0xff] }
  0x85   :  { %642 = vmatprep.subr.mxu1 %v320_v7  ;;  %574 = vmatpush1.msra.mxu0 %v253_v8  ;;  %v352_v7 = vld [vmem:[#allocation6 + $0x7f8] sm:$0xff]  ;;  %v285_v8 = vld [vmem:[#allocation6 + $0x5e0] sm:$0xff] }
  0x86   :  { %643 = vmatpush1.msra.mxu1 %v319_v9  ;;  %575 = vmatprep.subr.mxu0 %v252_v10  ;;  %v351_v9 = vld [vmem:[#allocation6 + $0x7f0] sm:$0xff]  ;;  %v284_v10 = vld [vmem:[#allocation6 + $0x5d8] sm:$0xff] }
  0x87   :  { %644 = vmatprep.subr.mxu1 %v318_v11  ;;  %576 = vmatpush1.msra.mxu0 %v251_v12  ;;  %v350_v11 = vld [vmem:[#allocation6 + $0x7e8] sm:$0xff]  ;;  %v283_v12 = vld [vmem:[#allocation6 + $0x5d0] sm:$0xff] }
  0x88   :  { %645 = vmatpush1.msra.mxu1 %v317_v13  ;;  %577 = vmatprep.subr.mxu0 %v250_v14  ;;  %v349_v13 = vld [vmem:[#allocation6 + $0x7e0] sm:$0xff]  ;;  %v282_v14 = vld [vmem:[#allocation6 + $0x5c8] sm:$0xff] }
  0x89   :  { %646 = vmatprep.subr.mxu1 %v316_v15  ;;  %578 = vmatpush1.msra.mxu0 %v249_v16  ;;  %v348_v15 = vld [vmem:[#allocation6 + $0x7d8] sm:$0xff]  ;;  %v281_v16 = vld [vmem:[#allocation6 + $0x5c0] sm:$0xff] }
  0x8a   :  { %647 = vmatpush1.msra.mxu1 %v315_v17  ;;  %579 = vmatprep.subr.mxu0 %v248_v18  ;;  %v347_v17 = vld [vmem:[#allocation6 + $0x7d0] sm:$0xff]  ;;  %v280_v18 = vld [vmem:[#allocation6 + $0x5b8] sm:$0xff] }
  0x8b   :  { %648 = vmatprep.subr.mxu1 %v314_v19  ;;  %580 = vmatpush1.msra.mxu0 %v247_v20  ;;  %v346_v19 = vld [vmem:[#allocation6 + $0x7c8] sm:$0xff]  ;;  %v279_v20 = vld [vmem:[#allocation6 + $0x5b0] sm:$0xff] }
  0x8c   :  { %649 = vmatpush1.msra.mxu1 %v313_v21  ;;  %581 = vmatprep.subr.mxu0 %v246_v22  ;;  %v345_v21 = vld [vmem:[#allocation6 + $0x7c0] sm:$0xff]  ;;  %v278_v22 = vld [vmem:[#allocation6 + $0x5a8] sm:$0xff] }
  0x8d   :  { %650 = vmatprep.subr.mxu1 %v312_v23  ;;  %582 = vmatpush1.msra.mxu0 %v245_v24  ;;  %v344_v23 = vld [vmem:[#allocation6 + $0x7b8] sm:$0xff]  ;;  %v277_v24 = vld [vmem:[#allocation6 + $0x5a0] sm:$0xff] }
  0x8e   :  { %651 = vmatpush1.msra.mxu1 %v311_v25  ;;  %583 = vmatprep.subr.mxu0 %v244_v26  ;;  %v343_v25 = vld [vmem:[#allocation6 + $0x7b0] sm:$0xff]  ;;  %v276_v26 = vld [vmem:[#allocation6 + $0x598] sm:$0xff] }
  0x8f   :  { %652 = vmatprep.subr.mxu1 %v310_v27  ;;  %584 = vmatpush1.msra.mxu0 %v243_v28  ;;  %v342_v27 = vld [vmem:[#allocation6 + $0x7a8] sm:$0xff]  ;;  %v275_v28 = vld [vmem:[#allocation6 + $0x590] sm:$0xff] }
  0x90   :  { %653 = vmatpush1.msra.mxu1 %v309_v29  ;;  %585 = vmatprep.subr.mxu0 %v242_v30  ;;  %v341_v29 = vld [vmem:[#allocation6 + $0x7a0] sm:$0xff]  ;;  %v274_v30 = vld [vmem:[#allocation6 + $0x588] sm:$0xff] }
  0x91   :  { %654 = vmatprep.subr.mxu1 %v308_v31  ;;  %586 = vmatpush1.msra.mxu0 %v241_v32  ;;  %v340_v31 = vld [vmem:[#allocation6 + $0x798] sm:$0xff]  ;;  %v273_v32 = vld [vmem:[#allocation6 + $0x580] sm:$0xff] }
  0x92   :  { %655 = vmatpush1.msra.mxu1 %v307_v33  ;;  %587 = vmatprep.subr.mxu0 %v240_v34  ;;  %v339_v33 = vld [vmem:[#allocation6 + $0x790] sm:$0xff]  ;;  %v272_v34 = vld [vmem:[#allocation6 + $0x578] sm:$0xff] }
  0x93   :  { %656 = vmatprep.subr.mxu1 %v306_v35  ;;  %588 = vmatpush1.msra.mxu0 %v239_v36  ;;  %v338_v35 = vld [vmem:[#allocation6 + $0x788] sm:$0xff]  ;;  %v271_v36 = vld [vmem:[#allocation6 + $0x570] sm:$0xff] }
  0x94   :  { %657 = vmatpush1.msra.mxu1 %v305_v37  ;;  %589 = vmatprep.subr.mxu0 %v238_v38  ;;  %v337_v37 = vld [vmem:[#allocation6 + $0x780] sm:$0xff]  ;;  %v270_v38 = vld [vmem:[#allocation6 + $0x568] sm:$0xff] }
  0x95   :  { %658 = vmatprep.subr.mxu1 %v304_v39  ;;  %590 = vmatpush1.msra.mxu0 %v237_v40  ;;  %v336_v39 = vld [vmem:[#allocation6 + $0x778] sm:$0xff]  ;;  %v269_v40 = vld [vmem:[#allocation6 + $0x560] sm:$0xff] }
  0x96   :  { %659 = vmatpush1.msra.mxu1 %v303_v41  ;;  %591 = vmatprep.subr.mxu0 %v236_v42  ;;  %v335_v41 = vld [vmem:[#allocation6 + $0x770] sm:$0xff]  ;;  %v268_v42 = vld [vmem:[#allocation6 + $0x558] sm:$0xff] }
  0x97   :  { %660 = vmatprep.subr.mxu1 %v302_v43  ;;  %592 = vmatpush1.msra.mxu0 %v235_v44  ;;  %v334_v43 = vld [vmem:[#allocation6 + $0x768] sm:$0xff]  ;;  %v267_v44 = vld [vmem:[#allocation6 + $0x550] sm:$0xff] }
  0x98   :  { %661 = vmatpush1.msra.mxu1 %v301_v45  ;;  %593 = vmatprep.subr.mxu0 %v234_v46  ;;  %v333_v45 = vld [vmem:[#allocation6 + $0x760] sm:$0xff]  ;;  %v266_v46 = vld [vmem:[#allocation6 + $0x548] sm:$0xff] }
  0x99   :  { %662 = vmatprep.subr.mxu1 %v300_v47  ;;  %594 = vmatpush1.msra.mxu0 %v233_v48  ;;  %v332_v47 = vld [vmem:[#allocation6 + $0x758] sm:$0xff]  ;;  %v265_v48 = vld [vmem:[#allocation6 + $0x540] sm:$0xff] }
  0x9a   :  { %663 = vmatpush1.msra.mxu1 %v299_v49  ;;  %595 = vmatprep.subr.mxu0 %v232_v50  ;;  %v331_v49 = vld [vmem:[#allocation6 + $0x750] sm:$0xff]  ;;  %v264_v50 = vld [vmem:[#allocation6 + $0x538] sm:$0xff] }
  0x9b   :  { %664 = vmatprep.subr.mxu1 %v298_v51  ;;  %596 = vmatpush1.msra.mxu0 %v231_v52  ;;  %v330_v51 = vld [vmem:[#allocation6 + $0x748] sm:$0xff]  ;;  %v263_v52 = vld [vmem:[#allocation6 + $0x530] sm:$0xff] }
  0x9c   :  { %665 = vmatpush1.msra.mxu1 %v297_v53  ;;  %597 = vmatprep.subr.mxu0 %v230_v54  ;;  %v329_v53 = vld [vmem:[#allocation6 + $0x740] sm:$0xff]  ;;  %v262_v54 = vld [vmem:[#allocation6 + $0x528] sm:$0xff] }
  0x9d   :  { %666 = vmatprep.subr.mxu1 %v296_v55  ;;  %598 = vmatpush1.msra.mxu0 %v229_v56  ;;  %v328_v55 = vld [vmem:[#allocation6 + $0x738] sm:$0xff]  ;;  %v261_v56 = vld [vmem:[#allocation6 + $0x520] sm:$0xff] }
  0x9e   :  { %667 = vmatpush1.msra.mxu1 %v295_v57  ;;  %599 = vmatprep.subr.mxu0 %v228_v58  ;;  %v327_v57 = vld [vmem:[#allocation6 + $0x730] sm:$0xff]  ;;  %v260_v58 = vld [vmem:[#allocation6 + $0x518] sm:$0xff] }
  0x9f   :  { %668 = vmatprep.subr.mxu1 %v294_v59  ;;  %600 = vmatpush1.msra.mxu0 %v227_v60  ;;  %v326_v59 = vld [vmem:[#allocation6 + $0x728] sm:$0xff]  ;;  %v259_v60 = vld [vmem:[#allocation6 + $0x510] sm:$0xff] }
  0xa0   :  { %669 = vmatpush1.msra.mxu1 %v293_v61  ;;  %601 = vmatprep.subr.mxu0 %v226_v62  ;;  %v325_v61 = vld [vmem:[#allocation6 + $0x720] sm:$0xff]  ;;  %v258_v62 = vld [vmem:[#allocation6 + $0x508] sm:$0xff] }
  0xa1   :  { %670 = vmatprep.subr.mxu1 %v292_v63  ;;  %602 = vmatpush1.msra.mxu0 %v225_v0  ;;  %v324_v63 = vld [vmem:[#allocation6 + $0x718] sm:$0xff]  ;;  %v257_v0 = vld [vmem:[#allocation6 + $0x500] sm:$0xff] }
  0xa2   :  { %671 = vmatpush1.msra.mxu1 %v291_v1  ;;  %603 = vmatprep.subr.mxu0 %v288_v2  ;;  %v92_v1 = vld [vmem:[#allocation3 + $0x28] sm:$0xff]  ;;  %v323_v2 = vld [vmem:[#allocation6 + $0x710] sm:$0xff] }
  0xa3   :  { %672 = vmatprep.subr.mxu1 %v290_v3  ;;  %604 = vmatpush2.msra.mxu0 %v287_v4  ;;  %v91_v3 = vld [vmem:[#allocation3 + $0x20] sm:$0xff]  ;;  %v322_v4 = vld [vmem:[#allocation6 + $0x708] sm:$0xff] }
  0xa4   :  { %673 = vmatpush1.msra.mxu1 %v289_v5  ;;  %605 = vmatprep.subr.mxu0 %v286_v6  ;;  %v384_v5 = vld [vmem:[#allocation6 + $0x8f8] sm:$0xff]  ;;  %v321_v6 = vld [vmem:[#allocation6 + $0x700] sm:$0xff] }
  0xa5   :  { %674 = vmatprep.subr.mxu1 %v352_v7  ;;  %606 = vmatpush2.msra.mxu0 %v285_v8  ;;  %v94_v7 = vld [vmem:[#allocation3 + $0x38] sm:$0xff]  ;;  %v383_v8 = vld [vmem:[#allocation6 + $0x8f0] sm:$0xff] }
  0xa6   :  { %675 = vmatpush2.msra.mxu1 %v351_v9  ;;  %607 = vmatprep.subr.mxu0 %v284_v10  ;;  %v93_v9 = vld [vmem:[#allocation3 + $0x30] sm:$0xff]  ;;  %v382_v10 = vld [vmem:[#allocation6 + $0x8e8] sm:$0xff] }
  0xa7   :  { %676 = vmatprep.subr.mxu1 %v350_v11  ;;  %608 = vmatpush2.msra.mxu0 %v283_v12  ;;  %v381_v11 = vld [vmem:[#allocation6 + $0x8e0] sm:$0xff]  ;;  %v96_v12 = vld [vmem:[#allocation3 + $0x48] sm:$0xff] }
  0xa8   :  { %677 = vmatpush2.msra.mxu1 %v349_v13  ;;  %609 = vmatprep.subr.mxu0 %v282_v14  ;;  %v380_v13 = vld [vmem:[#allocation6 + $0x8d8] sm:$0xff]  ;;  %v379_v14 = vld [vmem:[#allocation6 + $0x8d0] sm:$0xff] }
  0xa9   :  { %678 = vmatprep.subr.mxu1 %v348_v15  ;;  %610 = vmatpush2.msra.mxu0 %v281_v16  ;;  %v378_v15 = vld [vmem:[#allocation6 + $0x8c8] sm:$0xff]  ;;  %v377_v16 = vld [vmem:[#allocation6 + $0x8c0] sm:$0xff] }
  0xaa   :  { %679 = vmatpush2.msra.mxu1 %v347_v17  ;;  %611 = vmatprep.subr.mxu0 %v280_v18  ;;  %v376_v17 = vld [vmem:[#allocation6 + $0x8b8] sm:$0xff]  ;;  %v375_v18 = vld [vmem:[#allocation6 + $0x8b0] sm:$0xff] }
  0xab   :  { %680 = vmatprep.subr.mxu1 %v346_v19  ;;  %612 = vmatpush2.msra.mxu0 %v279_v20  ;;  %v374_v19 = vld [vmem:[#allocation6 + $0x8a8] sm:$0xff]  ;;  %v373_v20 = vld [vmem:[#allocation6 + $0x8a0] sm:$0xff] }
  0xac   :  { %681 = vmatpush2.msra.mxu1 %v345_v21  ;;  %613 = vmatprep.subr.mxu0 %v278_v22  ;;  %v372_v21 = vld [vmem:[#allocation6 + $0x898] sm:$0xff]  ;;  %v371_v22 = vld [vmem:[#allocation6 + $0x890] sm:$0xff] }
  0xad   :  { %682 = vmatprep.subr.mxu1 %v344_v23  ;;  %614 = vmatpush2.msra.mxu0 %v277_v24  ;;  %v370_v23 = vld [vmem:[#allocation6 + $0x888] sm:$0xff]  ;;  %v369_v24 = vld [vmem:[#allocation6 + $0x880] sm:$0xff] }
  0xae   :  { %683 = vmatpush2.msra.mxu1 %v343_v25  ;;  %615 = vmatprep.subr.mxu0 %v276_v26  ;;  %v368_v25 = vld [vmem:[#allocation6 + $0x878] sm:$0xff]  ;;  %v367_v26 = vld [vmem:[#allocation6 + $0x870] sm:$0xff] }
  0xaf   :  { %684 = vmatprep.subr.mxu1 %v342_v27  ;;  %616 = vmatpush2.msra.mxu0 %v275_v28  ;;  %v366_v27 = vld [vmem:[#allocation6 + $0x868] sm:$0xff]  ;;  %v365_v28 = vld [vmem:[#allocation6 + $0x860] sm:$0xff] }
  0xb0   :  { %685 = vmatpush2.msra.mxu1 %v341_v29  ;;  %617 = vmatprep.subr.mxu0 %v274_v30  ;;  %v364_v29 = vld [vmem:[#allocation6 + $0x858] sm:$0xff]  ;;  %v363_v30 = vld [vmem:[#allocation6 + $0x850] sm:$0xff] }
  0xb1   :  { %686 = vmatprep.subr.mxu1 %v340_v31  ;;  %618 = vmatpush2.msra.mxu0 %v273_v32  ;;  %v362_v31 = vld [vmem:[#allocation6 + $0x848] sm:$0xff]  ;;  %v361_v32 = vld [vmem:[#allocation6 + $0x840] sm:$0xff] }
  0xb2   :  { %687 = vmatpush2.msra.mxu1 %v339_v33  ;;  %619 = vmatprep.subr.mxu0 %v272_v34  ;;  %v360_v33 = vld [vmem:[#allocation6 + $0x838] sm:$0xff]  ;;  %v359_v34 = vld [vmem:[#allocation6 + $0x830] sm:$0xff] }
  0xb3   :  { %688 = vmatprep.subr.mxu1 %v338_v35  ;;  %620 = vmatpush2.msra.mxu0 %v271_v36  ;;  %v358_v35 = vld [vmem:[#allocation6 + $0x828] sm:$0xff]  ;;  %v357_v36 = vld [vmem:[#allocation6 + $0x820] sm:$0xff] }
  0xb4   :  { %689 = vmatpush2.msra.mxu1 %v337_v37  ;;  %621 = vmatprep.subr.mxu0 %v270_v38  ;;  %v356_v37 = vld [vmem:[#allocation6 + $0x818] sm:$0xff]  ;;  %v355_v38 = vld [vmem:[#allocation6 + $0x810] sm:$0xff] }
  0xb5   :  { %690 = vmatprep.subr.mxu1 %v336_v39  ;;  %622 = vmatpush2.msra.mxu0 %v269_v40  ;;  %v354_v39 = vld [vmem:[#allocation6 + $0x808] sm:$0xff]  ;;  %v353_v40 = vld [vmem:[#allocation6 + $0x800] sm:$0xff] }
  0xb6   :  { %691 = vmatpush2.msra.mxu1 %v335_v41  ;;  %623 = vmatprep.subr.mxu0 %v268_v42  ;;  %v416_v41 = vld [vmem:[#allocation6 + $0x9f8] sm:$0xff]  ;;  %v415_v42 = vld [vmem:[#allocation6 + $0x9f0] sm:$0xff] }
  0xb7   :  { %692 = vmatprep.subr.mxu1 %v334_v43  ;;  %624 = vmatpush2.msra.mxu0 %v267_v44  ;;  %v414_v43 = vld [vmem:[#allocation6 + $0x9e8] sm:$0xff]  ;;  %v413_v44 = vld [vmem:[#allocation6 + $0x9e0] sm:$0xff] }
  0xb8   :  { %693 = vmatpush2.msra.mxu1 %v333_v45  ;;  %625 = vmatprep.subr.mxu0 %v266_v46  ;;  %v412_v45 = vld [vmem:[#allocation6 + $0x9d8] sm:$0xff]  ;;  %v411_v46 = vld [vmem:[#allocation6 + $0x9d0] sm:$0xff] }
  0xb9   :  { %694 = vmatprep.subr.mxu1 %v332_v47  ;;  %626 = vmatpush2.msra.mxu0 %v265_v48  ;;  %v410_v47 = vld [vmem:[#allocation6 + $0x9c8] sm:$0xff]  ;;  %v409_v48 = vld [vmem:[#allocation6 + $0x9c0] sm:$0xff] }
  0xba   :  { %695 = vmatpush2.msra.mxu1 %v331_v49  ;;  %627 = vmatprep.subr.mxu0 %v264_v50  ;;  %v408_v49 = vld [vmem:[#allocation6 + $0x9b8] sm:$0xff]  ;;  %v407_v50 = vld [vmem:[#allocation6 + $0x9b0] sm:$0xff] }
  0xbb   :  { %696 = vmatprep.subr.mxu1 %v330_v51  ;;  %628 = vmatpush2.msra.mxu0 %v263_v52  ;;  %v406_v51 = vld [vmem:[#allocation6 + $0x9a8] sm:$0xff]  ;;  %v405_v52 = vld [vmem:[#allocation6 + $0x9a0] sm:$0xff] }
  0xbc   :  { %697 = vmatpush2.msra.mxu1 %v329_v53  ;;  %629 = vmatprep.subr.mxu0 %v262_v54  ;;  %v404_v53 = vld [vmem:[#allocation6 + $0x998] sm:$0xff]  ;;  %v403_v54 = vld [vmem:[#allocation6 + $0x990] sm:$0xff] }
  0xbd   :  { %698 = vmatprep.subr.mxu1 %v328_v55  ;;  %630 = vmatpush2.msra.mxu0 %v261_v56  ;;  %v402_v55 = vld [vmem:[#allocation6 + $0x988] sm:$0xff]  ;;  %v401_v56 = vld [vmem:[#allocation6 + $0x980] sm:$0xff] }
  0xbe   :  { %699 = vmatpush2.msra.mxu1 %v327_v57  ;;  %631 = vmatprep.subr.mxu0 %v260_v58  ;;  %v400_v57 = vld [vmem:[#allocation6 + $0x978] sm:$0xff]  ;;  %v399_v58 = vld [vmem:[#allocation6 + $0x970] sm:$0xff] }
  0xbf   :  { %700 = vmatprep.subr.mxu1 %v326_v59  ;;  %632 = vmatpush2.msra.mxu0 %v259_v60  ;;  %v398_v59 = vld [vmem:[#allocation6 + $0x968] sm:$0xff]  ;;  %v397_v60 = vld [vmem:[#allocation6 + $0x960] sm:$0xff] }
  0xc0   :  { %701 = vmatpush2.msra.mxu1 %v325_v61  ;;  %633 = vmatprep.subr.mxu0 %v258_v62  ;;  %v396_v61 = vld [vmem:[#allocation6 + $0x958] sm:$0xff]  ;;  %v395_v62 = vld [vmem:[#allocation6 + $0x950] sm:$0xff] }
  0xc1   :  { %702 = vmatprep.subr.mxu1 %v324_v63  ;;  %634 = vmatpush2.msra.mxu0 %v257_v0  ;;  %v394_v63 = vld [vmem:[#allocation6 + $0x948] sm:$0xff]  ;;  %v393_v0 = vld [vmem:[#allocation6 + $0x940] sm:$0xff] }
  0xc2   :  { %635 = vmatprep.mubr.f32.mxu0 %v92_v1  ;;  %703 = vmatpush2.msra.mxu1 %v323_v2  ;;  %v392_v1 = vld [vmem:[#allocation6 + $0x938] sm:$0xff]  ;;  %v391_v2 = vld [vmem:[#allocation6 + $0x930] sm:$0xff] }
  0xc3   :  { %636 = vmatmul.mubr.f32.vlgmr.msra.gmra.mxu0 %v91_v3  ;;  %704 = vmatprep.subr.mxu1 %v322_v4  ;;  %v390_v3 = vld [vmem:[#allocation6 + $0x928] sm:$0xff]  ;;  %v389_v4 = vld [vmem:[#allocation6 + $0x920] sm:$0xff] }
  0xc4   :  { %713 = vmatprep.subr.mxu0 %v384_v5  ;;  %705 = vmatpush2.msra.mxu1 %v321_v6  ;;  %v388_v5 = vld [vmem:[#allocation6 + $0x918] sm:$0xff]  ;;  %v387_v6 = vld [vmem:[#allocation6 + $0x910] sm:$0xff] }
  0xc5   :  { %706 = vmatprep.mubr.f32.mxu1 %v94_v7  ;;  %714 = vmatpush1.msra.mxu0 %v383_v8  ;;  %v386_v7 = vld [vmem:[#allocation6 + $0x908] sm:$0xff]  ;;  %v385_v8 = vld [vmem:[#allocation6 + $0x900] sm:$0xff] }
  0xc6   :  { %707 = vmatmul.mubr.f32.vlgmr.msra.gmra.mxu1 %v93_v9  ;;  %715 = vmatprep.subr.mxu0 %v382_v10  ;;  %v95_v9 = vld [vmem:[#allocation3 + $0x40] sm:$0xff]  ;;  %v823_v10 = vld [vmem:[#allocation9 + $0xf8] sm:$0xff] }
  0xc7   :  { %716 = vmatpush1.msra.mxu0 %v381_v11  ;;  %777 = vmatprep.mubr.f32.mxu0 %v96_v12  ;;  %v807_v11 = vld [vmem:[#allocation9 + $0x78] sm:$0xff]  ;;  %v822_v12 = vld [vmem:[#allocation9 + $0xf0] sm:$0xff] }
  0xc8   :  { %717 = vmatprep.subr.mxu0 %v380_v13  ;;  %920 = vmatprep.subr.mxu1 %v823_v10  ;;  %v806_v13 = vld [vmem:[#allocation9 + $0x70] sm:$0xff] }
  0xc9   :  { %718 = vmatpush1.msra.mxu0 %v379_v14  ;;  %921 = vmatpush3.msra.mxu1 %v807_v11  ;;  %v821_v14 = vld [vmem:[#allocation9 + $0xe8] sm:$0xff]  ;;  %v919_v11 = vld [vmem:[#allocation11] ss:$0 sm:$0xff] }
  0xca   :  { %719 = vmatprep.subr.mxu0 %v378_v15  ;;  %922 = vmatprep.subr.mxu1 %v822_v12  ;;  %v805_v15 = vld [vmem:[#allocation9 + $0x68] sm:$0xff] }
  0xcb   :  { %720 = vmatpush1.msra.mxu0 %v377_v16  ;;  %923 = vmatpush3.msra.mxu1 %v806_v13  ;;  %v820_v16 = vld [vmem:[#allocation9 + $0xe0] sm:$0xff] }
  0xcc   :  { %721 = vmatprep.subr.mxu0 %v376_v17  ;;  %924 = vmatprep.subr.mxu1 %v821_v14  ;;  %v804_v17 = vld [vmem:[#allocation9 + $0x60] sm:$0xff] }
  0xcd   :  { %722 = vmatpush1.msra.mxu0 %v375_v18  ;;  %925 = vmatpush3.msra.mxu1 %v805_v15  ;;  %v819_v18 = vld [vmem:[#allocation9 + $0xd8] sm:$0xff] }
  0xce   :  { %723 = vmatprep.subr.mxu0 %v374_v19  ;;  %926 = vmatprep.subr.mxu1 %v820_v16  ;;  %v803_v19 = vld [vmem:[#allocation9 + $0x58] sm:$0xff] }
  0xcf   :  { %724 = vmatpush1.msra.mxu0 %v373_v20  ;;  %927 = vmatpush3.msra.mxu1 %v804_v17  ;;  %v818_v20 = vld [vmem:[#allocation9 + $0xd0] sm:$0xff] }
  0xd0   :  { %725 = vmatprep.subr.mxu0 %v372_v21  ;;  %928 = vmatprep.subr.mxu1 %v819_v18  ;;  %v802_v21 = vld [vmem:[#allocation9 + $0x50] sm:$0xff] }
  0xd1   :  { %726 = vmatpush1.msra.mxu0 %v371_v22  ;;  %929 = vmatpush3.msra.mxu1 %v803_v19  ;;  %v817_v22 = vld [vmem:[#allocation9 + $0xc8] sm:$0xff] }
  0xd2   :  { %727 = vmatprep.subr.mxu0 %v370_v23  ;;  %930 = vmatprep.subr.mxu1 %v818_v20  ;;  %v801_v23 = vld [vmem:[#allocation9 + $0x48] sm:$0xff] }
  0xd3   :  { %728 = vmatpush1.msra.mxu0 %v369_v24  ;;  %931 = vmatpush3.msra.mxu1 %v802_v21  ;;  %v816_v24 = vld [vmem:[#allocation9 + $0xc0] sm:$0xff] }
  0xd4   :  { %729 = vmatprep.subr.mxu0 %v368_v25  ;;  %932 = vmatprep.subr.mxu1 %v817_v22  ;;  %v800_v25 = vld [vmem:[#allocation9 + $0x40] sm:$0xff] }
  0xd5   :  { %730 = vmatpush1.msra.mxu0 %v367_v26  ;;  %933 = vmatpush3.msra.mxu1 %v801_v23  ;;  %v815_v26 = vld [vmem:[#allocation9 + $0xb8] sm:$0xff] }
  0xd6   :  { %731 = vmatprep.subr.mxu0 %v366_v27  ;;  %934 = vmatprep.subr.mxu1 %v816_v24  ;;  %v799_v27 = vld [vmem:[#allocation9 + $0x38] sm:$0xff] }
  0xd7   :  { %732 = vmatpush1.msra.mxu0 %v365_v28  ;;  %935 = vmatpush3.msra.mxu1 %v800_v25  ;;  %v814_v28 = vld [vmem:[#allocation9 + $0xb0] sm:$0xff] }
  0xd8   :  { %733 = vmatprep.subr.mxu0 %v364_v29  ;;  %936 = vmatprep.subr.mxu1 %v815_v26  ;;  %v798_v29 = vld [vmem:[#allocation9 + $0x30] sm:$0xff] }
  0xd9   :  { %734 = vmatpush1.msra.mxu0 %v363_v30  ;;  %937 = vmatpush3.msra.mxu1 %v799_v27  ;;  %v813_v30 = vld [vmem:[#allocation9 + $0xa8] sm:$0xff] }
  0xda   :  { %735 = vmatprep.subr.mxu0 %v362_v31  ;;  %938 = vmatprep.subr.mxu1 %v814_v28  ;;  %v797_v31 = vld [vmem:[#allocation9 + $0x28] sm:$0xff] }
  0xdb   :  { %736 = vmatpush1.msra.mxu0 %v361_v32  ;;  %939 = vmatpush3.msra.mxu1 %v798_v29  ;;  %v812_v32 = vld [vmem:[#allocation9 + $0xa0] sm:$0xff] }
  0xdc   :  { %737 = vmatprep.subr.mxu0 %v360_v33  ;;  %940 = vmatprep.subr.mxu1 %v813_v30  ;;  %v796_v33 = vld [vmem:[#allocation9 + $0x20] sm:$0xff] }
  0xdd   :  { %738 = vmatpush1.msra.mxu0 %v359_v34  ;;  %941 = vmatpush3.msra.mxu1 %v797_v31  ;;  %v811_v34 = vld [vmem:[#allocation9 + $0x98] sm:$0xff] }
  0xde   :  { %739 = vmatprep.subr.mxu0 %v358_v35  ;;  %942 = vmatprep.subr.mxu1 %v812_v32  ;;  %v795_v35 = vld [vmem:[#allocation9 + $0x18] sm:$0xff] }
  0xdf   :  { %740 = vmatpush1.msra.mxu0 %v357_v36  ;;  %943 = vmatpush3.msra.mxu1 %v796_v33  ;;  %v810_v36 = vld [vmem:[#allocation9 + $0x90] sm:$0xff] }
  0xe0   :  { %741 = vmatprep.subr.mxu0 %v356_v37  ;;  %944 = vmatprep.subr.mxu1 %v811_v34  ;;  %v794_v37 = vld [vmem:[#allocation9 + $0x10] sm:$0xff] }
  0xe1   :  { %742 = vmatpush1.msra.mxu0 %v355_v38  ;;  %945 = vmatpush3.msra.mxu1 %v795_v35  ;;  %v809_v38 = vld [vmem:[#allocation9 + $0x88] sm:$0xff] }
  0xe2   :  { %743 = vmatprep.subr.mxu0 %v354_v39  ;;  %946 = vmatprep.subr.mxu1 %v810_v36  ;;  %v793_v39 = vld [vmem:[#allocation9 + $0x8] sm:$0xff] }
  0xe3   :  { %744 = vmatpush1.msra.mxu0 %v353_v40  ;;  %947 = vmatpush3.msra.mxu1 %v794_v37  ;;  %v808_v40 = vld [vmem:[#allocation9 + $0x80] sm:$0xff] }
  0xe4   :  { %745 = vmatprep.subr.mxu0 %v416_v41  ;;  %948 = vmatprep.subr.mxu1 %v809_v38  ;;  %v792_v41 = vld [vmem:[#allocation9] sm:$0xff] }
  0xe5   :  { %746 = vmatpush2.msra.mxu0 %v415_v42  ;;  %949 = vmatpush3.msra.mxu1 %v793_v39  ;;  %v419_v42 = vlaneseq }
  0xe6   :  { %747 = vmatprep.subr.mxu0 %v414_v43  ;;  %950 = vmatprep.subr.mxu1 %v808_v40 }
  0xe7   :  { %748 = vmatpush2.msra.mxu0 %v413_v44  ;;  %951 = vmatpush3.msra.mxu1 %v792_v41  ;;  %v420_v43 = vshrl.u32 %v419_v42, 7 }
  0xe8   :  { %749 = vmatprep.subr.mxu0 %v412_v45  ;;  %v417_v45 = vld [vmem:[#allocation8] sm:$0x3] }
  0xe9   :  { %750 = vmatpush2.msra.mxu0 %v411_v46  ;;  %v421_v44 = vsub.s32 0, %v420_v43  ;;  %v425_v46 = vsub.s32 1, %v420_v43 }
  0xea   :  { %751 = vmatprep.subr.mxu0 %v410_v47 }
  0xeb   :  { %752 = vmatpush2.msra.mxu0 %v409_v48  ;;  %v422_v48 = vrot.slane %v417_v45, %v421_v44 }
  0xec   :  { %753 = vmatprep.subr.mxu0 %v408_v49  ;;  %v426_v49 = vrot.slane %v417_v45, %v425_v46 }
  0xed   :  { %754 = vmatpush2.msra.mxu0 %v407_v50 }
  0xee   :  { %755 = vmatprep.subr.mxu0 %v406_v51 }
  0xef   :  { %756 = vmatpush2.msra.mxu0 %v405_v52 }
  0xf0   :  { %757 = vmatprep.subr.mxu0 %v404_v53 }
  0xf1   :  { %758 = vmatpush2.msra.mxu0 %v403_v54 }
  0xf2   :  { %759 = vmatprep.subr.mxu0 %v402_v55 }
  0xf3   :  { %760 = vmatpush2.msra.mxu0 %v401_v56 }
  0xf4   :  { %761 = vmatprep.subr.mxu0 %v400_v57 }
  0xf5   :  { %762 = vmatpush2.msra.mxu0 %v399_v58 }
  0xf6   :  { %763 = vmatprep.subr.mxu0 %v398_v59 }
  0xf7   :  { %764 = vmatpush2.msra.mxu0 %v397_v60 }
  0xf8   :  { %765 = vmatprep.subr.mxu0 %v396_v61 }
  0xf9   :  { %766 = vmatpush2.msra.mxu0 %v395_v62 }
  0xfa   :  { %767 = vmatprep.subr.mxu0 %v394_v63 }
  0xfb   :  { %768 = vmatpush2.msra.mxu0 %v393_v0 }
  0xfc   :  { %769 = vmatprep.subr.mxu0 %v392_v1 }
  0xfd   :  { %770 = vmatpush2.msra.mxu0 %v391_v2 }
  0xfe   :  { %771 = vmatprep.subr.mxu0 %v390_v3  ;;  %v787_v3 = vstv %s1162_s3  ;;  %s1065_s3 = scalar_lea.vmem %s909_s25, 128 }
  0xff   :  { %772 = vmatpush2.msra.mxu0 %v389_v4  ;;  %p1066_p11 = scmp.ne.s32.totalorder %s909_s25, %s1065_s3  ;;  %p1071_p13 = scmp.lt.s32.totalorder %s1065_s3, %s1065_s3 }
 0x100   :  { %773 = vmatprep.subr.mxu0 %v388_v5 }
 0x101   :  { %774 = vmatpush2.msra.mxu0 %v387_v6  ;;  %p1072_p0 = por %p1071_p13, %p1070_p12 }
 0x102   :  { %775 = vmatprep.subr.mxu0 %v386_v7 }
 0x103   :  { %776 = vmatpush2.msra.mxu0 %v385_v8  ;;  %p1073_p1 = pnand %p1072_p0, %p1066_p11 }
 0x104   :  { %778 = vmatmul.mubr.f32.vlgmr.msra.gmra.mxu0 %v95_v9 }
 0x141   :  { %v495_v47 = vpop.f32.mrf.mxu0 }
 0x142   :  { %v496_v52 = vadd.f32 %v495_v47, %v422_v48 }
 0x143   :  { %v497_v50 = vpop.f32.mrf.mxu0 }
 0x144   :  { %v566_v51 = vpop.f32.mrf.mxu1  ;;  %v498_v54 = vadd.f32 %v497_v50, %v426_v49 }
 0x145   :  { %v567_v56 = vadd.f32 %v566_v51, %v496_v52 }
 0x146   :  { %v568_v55 = vpop.f32.mrf.mxu1 }
 0x147   :  { %v569_v59 = vadd.f32 %v568_v55, %v498_v54 }
 0x183   :  { %v637_v53 = vpop.f32.mrf.mxu0 }
 0x184   :  { %v638_v60 = vadd.f32 %v637_v53, %v567_v56 }
 0x185   :  { %v639_v57 = vpop.f32.mrf.mxu0 }
 0x186   :  { %v708_v58 = vpop.f32.mrf.mxu1  ;;  %v640_v61 = vadd.f32 %v639_v57, %v569_v59 }
 0x187   :  { %v709_v63 = vadd.f32 %v708_v58, %v638_v60 }
 0x188   :  { %v710_v62 = vpop.f32.mrf.mxu1 }
 0x189   :  { %v711_v1 = vadd.f32 %v710_v62, %v640_v61 }
 0x1c4   :  { %v779_v0 = vpop.f32.mrf.mxu0 }
 0x1c5   :  { %v780_v2 = vadd.f32 %v779_v0, %v709_v63 }
 0x1c6   :  { %v781_v4 = vpop.f32.mrf.mxu0 }
 0x1c7   :  { %v782_v5 = vadd.f32 %v781_v4, %v711_v1  ;;  %v788_v6 = vmul.f32 %v787_v3, %v780_v2  ;;  %vm785_vm0 = vcmp.gt.f32.partialorder %v780_v2, 0.0 }
 0x1c9   :  { %v789_v7 = vmul.f32 %v787_v3, %v782_v5  ;;  %vm786_vm1 = vcmp.gt.f32.partialorder %v782_v5, 0.0  ;;  %v790_v9 = vsel %vm785_vm0, %v780_v2, %v788_v6 }
 0x1cb   :  { %v791_v8 = vsel %vm786_vm1, %v782_v5, %v789_v7 }
 0x1cc   :  { %895 = vmatprep.mubr.f32.mxu1 %v791_v8 }
 0x1cd   :  { %896 = vmatmul.mubr.f32.vlgmr.msra.gmra.mxu1 %v790_v9 }
 0x28d   :  { %v952_v10 = vpop.f32.mrf.mxu1 }
 0x28f   :  { %v953_v12 = vpop.f32.mrf.mxu1 }
 0x290   :  { %v954_v13 = vadd.f32 %v953_v12, %v952_v10 }
 0x292   :  { %v898_v14 = vadd.f32 %v954_v13, %v919_v11 }
 0x294   :  { %901 = vst [vmem:[#allocation12] sm:$0xff] %v898_v14 }
 0x295   :  { %1076 = shalt.err (!%p1073_p1)
}
 0x296   :  { %911 = dma.vmem_to_hbm [thread:$0]  %s909_s25, 128, %s1165_s6, [#allocation5]  }
 0x297   :  { %1091 = dma.done.wait [#allocation5], 128  }
 0x298   :  { %1092 = vsyncadd [#allocation5], 4294967168 }
 0x299   :  { %915 = vsyncpa [#allocation4], 1 }
 0x29a   :  { %916 = vsyncpa [#allocation7], 1 }
 0x29b   :  { %917 = vsyncpa [#allocation10], 1 }
 0x29c   :  { %918 = vsyncpa [#allocation5], 1 }

</bundles_post_ra>
